<compile_context>
chip_gen: v5e
topology: v5e:2x2
jax: 0.10.0
libtpu: 0.0.40
codegen_flags: <defaults>
</compile_context>

<pallas_src>
import functools

import jax
import jax.numpy as jnp
from jax.experimental import pallas as pl
from jax.experimental.pallas import tpu as pltpu


_LANE = 128
_SUBLANE = 8
_MAX_TILE_B = 512


def _round_up(v: int, m: int) -> int:
    return ((v + m - 1) // m) * m


def _act_fn(activation: str):
    if activation == "tanh":
        return jnp.tanh
    return lambda v: jnp.maximum(v, 0.0)  # relu (validated in wrapper)


# --------------------------------------------------------------------------
# Kernels
# --------------------------------------------------------------------------
def _mlp_kernel_resident(x_ref, w_ref, b_ref, o_ref, *, activation, num_layers,
                         din_pad):
    """Grid = (batch_tiles,).  Whole weight stack resident in VMEM; all layers
    unrolled in-kernel.  Running activation stays a value (no scratch)."""
    act = _act_fn(activation)

    # Layer 0: x is read at native width; only the first din_pad rows of W[0]
    # are non-zero / used.  bf16 operands on the MXU, f32 accumulation.
    h = jnp.dot(x_ref[...].astype(jnp.bfloat16), w_ref[0, :din_pad, :],
                preferred_element_type=jnp.float32)
    h = act(h + b_ref[0])

    for l in range(1, num_layers):
        h = jnp.dot(h.astype(jnp.bfloat16), w_ref[l],
                    preferred_element_type=jnp.float32)
        h = act(h + b_ref[l])

    o_ref[...] = h


def _mlp_kernel_streaming(x_ref, w_ref, b_ref, o_ref, *, activation, din_pad):
    """Grid = (batch_tiles, num_layers).  One layer's weights streamed per step;
    the output block is the running accumulator (resident across the layer
    axis).  Bias stack is fully resident (tiny)."""
    act = _act_fn(activation)
    l = pl.program_id(1)

    @pl.when(l == 0)
    def _():
        h0 = jnp.dot(x_ref[...].astype(jnp.bfloat16), w_ref[0, :din_pad, :],
                     preferred_element_type=jnp.float32)
        o_ref[...] = act(h0 + b_ref[0])

    @pl.when(l > 0)
    def _():
        h = jnp.dot(o_ref[...].astype(jnp.bfloat16), w_ref[0],
                    preferred_element_type=jnp.float32)
        o_ref[...] = act(h + b_ref[l])


# --------------------------------------------------------------------------
# Parameter prep
# --------------------------------------------------------------------------
def prepare_params(w0, b0, w_rest, b_rest):
    """Zero-pad to a lane-dense width D and stack all layers.

    w0:     (input_dim, output_dim)  -- pre-transposed vs. torch Linear
    b0:     (1, output_dim)
    w_rest: (L-1, output_dim, output_dim)
    b_rest: (L-1, 1, output_dim)
    Returns W: (L, D, D) bfloat16, Bv: (L, 1, D) float32, D multiple of 128.
    Padded rows/cols/bias are zero, so padded lanes stay exactly zero through
    tanh/relu (act(0) == 0) and slicing the result back is exact.
    """
    input_dim, output_dim = w0.shape
    D = max(_round_up(input_dim, _LANE), _round_up(output_dim, _LANE))
    L = 1 + int(w_rest.shape[0])

    W = jnp.zeros((L, D, D), jnp.float32)
    Bv = jnp.zeros((L, 1, D), jnp.float32)
    W = W.at[0, :input_dim, :output_dim].set(w0.astype(jnp.float32))
    Bv = Bv.at[0, :, :output_dim].set(b0.astype(jnp.float32))
    if L > 1:
        W = W.at[1:, :output_dim, :output_dim].set(w_rest.astype(jnp.float32))
        Bv = Bv.at[1:, :, :output_dim].set(b_rest.astype(jnp.float32))
    return W.astype(jnp.bfloat16), Bv


# --------------------------------------------------------------------------
# Planning (tile size, residency, VMEM limit)
# --------------------------------------------------------------------------
def _vmem_capacity_bytes() -> int:
    try:
        return int(pltpu.get_tpu_info().vmem_capacity_bytes)
    except Exception:
        return 64 * 1024 * 1024  # v7x-conservative fallback


def _plan(B, D, din_pad, L):
    cap = _vmem_capacity_bytes()
    budget = int(cap * 0.75)

    # Batch tile: >=2 parallel programs for non-tiny batches (v7x megacore),
    # 128-aligned M for large batches (MXU fill), sublane-aligned otherwise.
    if B <= 16:
        tile_b = _round_up(max(B, 1), _SUBLANE)
    elif B < 1024:
        tile_b = max(_SUBLANE, _round_up((B + 1) // 2, _SUBLANE))
        if B >= 256:
            tile_b = max(_LANE, _round_up(tile_b, _LANE))
        tile_b = min(tile_b, _MAX_TILE_B)
    else:
        tile_b = _MAX_TILE_B

    def act_bytes(tb):
        # x tile + out tile (double-buffered by the pipeline) plus f32/bf16
        # temporaries for the running activation inside the kernel.
        return 4 * (2 * tb * din_pad) + 4 * (2 * tb * D) + 8 * tb * D

    w_resident = 2 * (L * D * D * 2 + L * D * 4)   # bf16 weights + f32 bias
    w_stream = 2 * (D * D * 2) + 2 * (L * D * 4)   # one layer double-buffered

    # Shrink tile_b until at least the streaming working set fits the budget.
    while tile_b > _SUBLANE and act_bytes(tile_b) + w_stream > budget:
        tile_b = max(_SUBLANE, _round_up(tile_b // 2, _SUBLANE))

    resident = (act_bytes(tile_b) + w_resident) <= budget
    need = act_bytes(tile_b) + (w_resident if resident else w_stream)

    # Clamp against real device capacity (not a fixed 100 MiB) with headroom.
    vmem_limit = min(cap - (8 << 20), max(need + (4 << 20), 32 << 20))
    return tile_b, resident, vmem_limit


# --------------------------------------------------------------------------
# Forward wrapper
# --------------------------------------------------------------------------
def numeric_mlp_forward(x, W, Bv, input_dim, output_dim, *, activation: str):
    """Fused MLP forward.  x: (B, input_dim) -> (B, output_dim) float32."""
    if activation not in ("tanh", "relu"):
        raise ValueError("unknown activation function specified")

    B = x.shape[0]
    L, D, _ = W.shape
    din_pad = _round_up(input_dim, _SUBLANE)

    x32 = x.astype(jnp.float32)
    if din_pad != input_dim:  # sublane pad only (no lane padding of x in HBM)
        x32 = jnp.pad(x32, ((0, 0), (0, din_pad - input_dim)))

    tile_b, resident, vmem_limit = _plan(B, D, din_pad, L)
    B_pad = _round_up(max(B, 1), tile_b)
    if B_pad != B:
        x32 = jnp.pad(x32, ((0, B_pad - B), (0, 0)))
    num_tiles = B_pad // tile_b

    if resident:
        kernel = functools.partial(_mlp_kernel_resident, activation=activation,
                                   num_layers=L, din_pad=din_pad)
        grid = (num_tiles,)
        in_specs = [
            pl.BlockSpec((tile_b, din_pad), lambda b: (b, 0)),   # x
            pl.BlockSpec((L, D, D), lambda b: (0, 0, 0)),        # W (resident)
            pl.BlockSpec((L, 1, D), lambda b: (0, 0, 0)),        # bias (resident)
        ]
        out_specs = pl.BlockSpec((tile_b, D), lambda b: (b, 0))
        dims = ("parallel",)
    else:
        kernel = functools.partial(_mlp_kernel_streaming, activation=activation,
                                   din_pad=din_pad)
        grid = (num_tiles, L)
        in_specs = [
            pl.BlockSpec((tile_b, din_pad), lambda b, l: (b, 0)),  # x
            pl.BlockSpec((1, D, D), lambda b, l: (l, 0, 0)),       # W (streamed)
            pl.BlockSpec((L, 1, D), lambda b, l: (0, 0, 0)),       # bias (resident)
        ]
        out_specs = pl.BlockSpec((tile_b, D), lambda b, l: (b, 0))
        dims = ("parallel", "arbitrary")

    out_pad = pl.pallas_call(
        kernel,
        out_shape=jax.ShapeDtypeStruct((B_pad, D), jnp.float32),
        grid_spec=pltpu.PrefetchScalarGridSpec(
            num_scalar_prefetch=0,
            grid=grid,
            in_specs=in_specs,
            out_specs=out_specs,
        ),
        compiler_params=pltpu.CompilerParams(
            dimension_semantics=dims,
            vmem_limit_bytes=int(vmem_limit),
        ),
    )(x32, W, Bv)

    return out_pad[:B, :output_dim]


# --------------------------------------------------------------------------
# Test harness
# --------------------------------------------------------------------------
def init_numeric_mlp_params(key, input_dim, output_dim, num_layers):
    """Deterministic synthetic params (same shapes as NumericMLP.__init__);
    weights stored pre-transposed as (in, out)."""
    keys = jax.random.split(key, 2 * num_layers)
    w0 = jax.random.normal(keys[0], (input_dim, output_dim), jnp.float32) * 0.1
    b0 = jax.random.normal(keys[1], (1, output_dim), jnp.float32) * 0.1
    w_rest, b_rest = [], []
    for i in range(1, num_layers):
        w_rest.append(jax.random.normal(keys[2 * i], (output_dim, output_dim),
                                        jnp.float32) * 0.1)
        b_rest.append(jax.random.normal(keys[2 * i + 1], (1, output_dim),
                                        jnp.float32) * 0.1)
    if w_rest:
        w_rest = jnp.stack(w_rest, axis=0)
        b_rest = jnp.stack(b_rest, axis=0)
    else:
        w_rest = jnp.zeros((0, output_dim, output_dim), jnp.float32)
        b_rest = jnp.zeros((0, 1, output_dim), jnp.float32)
    return w0, b0, w_rest, b_rest


def reference_forward_f32(x, w0, b0, w_rest, b_rest, activation):
    act = _act_fn(activation)
    h = act(x @ w0 + b0)
    for i in range(w_rest.shape[0]):
        h = act(h @ w_rest[i] + b_rest[i])
    return h


def reference_forward_bf16(x, w0, b0, w_rest, b_rest, activation):
    """Reference that matches the kernel's mixed precision (bf16 MXU operands,
    f32 accumulation, f32 bias/activation)."""
    act = _act_fn(activation)

    def lin(h, w, b):
        y = jnp.dot(h.astype(jnp.bfloat16), w.astype(jnp.bfloat16),
                    preferred_element_type=jnp.float32)
        return act(y + b)

    h = lin(x, w0, b0)
    for i in range(w_rest.shape[0]):
        h = lin(h, w_rest[i], b_rest[i])
    return h


if __name__ == "__main__":
    batch = 8
    input_dim = 16
    output_dim = 32
    num_layers = 3

    key = jax.random.PRNGKey(0)
    k_x, k_p = jax.random.split(key)
    x = jax.random.normal(k_x, (batch, input_dim), jnp.float32)
    w0, b0, w_rest, b_rest = init_numeric_mlp_params(
        k_p, input_dim, output_dim, num_layers)

    # Pad + stack once at parameter-setup time (lane-dense D, bf16 weights).
    W, Bv = prepare_params(w0, b0, w_rest, b_rest)

    ok = True
    for activation in ("tanh", "relu"):
        out = numeric_mlp_forward(x, W, Bv, input_dim, output_dim,
                                  activation=activation)
        out = jax.block_until_ready(out)
        assert out.shape == (batch, output_dim)

        ref_bf16 = reference_forward_bf16(x, w0, b0, w_rest, b_rest, activation)
        ref_f32 = reference_forward_f32(x, w0, b0, w_rest, b_rest, activation)

        # Tight check vs. a reference with matching bf16-weight precision, plus
        # a loose sanity check vs. the full-f32 reference.
        ok &= bool(jnp.allclose(out, ref_bf16, atol=1e-3, rtol=1e-3))
        ok &= bool(jnp.allclose(out, ref_f32, atol=2.5e-2, rtol=2.5e-2))

    assert ok, "mismatch vs reference"
    print("KERNEL_OK")
</pallas_src>

<mosaic_0001>
module attributes {stable_mosaic.version = 11 : i64} {
  func.func @_mlp_kernel_resident(%arg0: i32, %arg1: memref<8x16xf32, #tpu.memory_space<vmem>>, %arg2: memref<3x128x128xbf16, #tpu.memory_space<vmem>>, %arg3: memref<3x1x128xf32, #tpu.memory_space<vmem>>, %arg4: memref<8x128xf32, #tpu.memory_space<vmem>>) attributes {dimension_semantics = [#tpu.dimension_semantics<parallel>], iteration_bounds = array<i64: 1>, scalar_prefetch = 0 : i64, scratch_operands = 0 : i64, tpu.core_type = #tpu.core_type<tc>, window_params = [{transform_indices = @transform_0, window_bounds = array<i64: 8, 16>}, {pipeline_mode = #tpu.pipeline_mode<synchronous>, transform_indices = @transform_1, window_bounds = array<i64: 3, 128, 128>}, {pipeline_mode = #tpu.pipeline_mode<synchronous>, transform_indices = @transform_2, window_bounds = array<i64: 3, 1, 128>}, {transform_indices = @transform_3, window_bounds = array<i64: 8, 128>}]} {
    %c0 = arith.constant 0 : index
    %c0_0 = arith.constant 0 : index
    %0 = vector.load %arg1[%c0, %c0_0] : memref<8x16xf32, #tpu.memory_space<vmem>>, vector<8x16xf32>
    %1 = arith.truncf %0 : vector<8x16xf32> to vector<8x16xbf16>
    %c0_1 = arith.constant 0 : index
    %c0_2 = arith.constant 0 : index
    %c0_3 = arith.constant 0 : index
    %2 = vector.load %arg2[%c0_1, %c0_2, %c0_3] : memref<3x128x128xbf16, #tpu.memory_space<vmem>>, vector<1x16x128xbf16>
    %3 = vector.shape_cast %2 : vector<1x16x128xbf16> to vector<16x128xbf16>
    %cst = arith.constant dense<0.000000e+00> : vector<8x128xf32>
    %4 = tpu.matmul %1, %3, %cst {dimension_numbers = #tpu.dot_dimension_numbers<[1], [0], [0], [1], [0, 0, 1, 1], [], []>} : vector<8x16xbf16>, vector<16x128xbf16>, vector<8x128xf32> -> vector<8x128xf32>
    %c0_4 = arith.constant 0 : index
    %c0_5 = arith.constant 0 : index
    %c0_6 = arith.constant 0 : index
    %5 = vector.load %arg3[%c0_4, %c0_5, %c0_6] : memref<3x1x128xf32, #tpu.memory_space<vmem>>, vector<1x1x128xf32>
    %6 = vector.shape_cast %5 : vector<1x1x128xf32> to vector<1x128xf32>
    %7 = vector.broadcast %6 : vector<1x128xf32> to vector<8x128xf32>
    %8 = arith.addf %4, %7 : vector<8x128xf32>
    %9 = math.tanh %8 : vector<8x128xf32>
    %10 = arith.truncf %9 : vector<8x128xf32> to vector<8x128xbf16>
    %c1 = arith.constant 1 : index
    %c0_7 = arith.constant 0 : index
    %c0_8 = arith.constant 0 : index
    %11 = vector.load %arg2[%c1, %c0_7, %c0_8] : memref<3x128x128xbf16, #tpu.memory_space<vmem>>, vector<1x128x128xbf16>
    %12 = vector.shape_cast %11 : vector<1x128x128xbf16> to vector<128x128xbf16>
    %cst_9 = arith.constant dense<0.000000e+00> : vector<8x128xf32>
    %13 = tpu.matmul %10, %12, %cst_9 {dimension_numbers = #tpu.dot_dimension_numbers<[1], [0], [0], [1], [0, 0, 1, 1], [], []>} : vector<8x128xbf16>, vector<128x128xbf16>, vector<8x128xf32> -> vector<8x128xf32>
    %c1_10 = arith.constant 1 : index
    %c0_11 = arith.constant 0 : index
    %c0_12 = arith.constant 0 : index
    %14 = vector.load %arg3[%c1_10, %c0_11, %c0_12] : memref<3x1x128xf32, #tpu.memory_space<vmem>>, vector<1x1x128xf32>
    %15 = vector.shape_cast %14 : vector<1x1x128xf32> to vector<1x128xf32>
    %16 = vector.broadcast %15 : vector<1x128xf32> to vector<8x128xf32>
    %17 = arith.addf %13, %16 : vector<8x128xf32>
    %18 = math.tanh %17 : vector<8x128xf32>
    %19 = arith.truncf %18 : vector<8x128xf32> to vector<8x128xbf16>
    %c2 = arith.constant 2 : index
    %c0_13 = arith.constant 0 : index
    %c0_14 = arith.constant 0 : index
    %20 = vector.load %arg2[%c2, %c0_13, %c0_14] : memref<3x128x128xbf16, #tpu.memory_space<vmem>>, vector<1x128x128xbf16>
    %21 = vector.shape_cast %20 : vector<1x128x128xbf16> to vector<128x128xbf16>
    %cst_15 = arith.constant dense<0.000000e+00> : vector<8x128xf32>
    %22 = tpu.matmul %19, %21, %cst_15 {dimension_numbers = #tpu.dot_dimension_numbers<[1], [0], [0], [1], [0, 0, 1, 1], [], []>} : vector<8x128xbf16>, vector<128x128xbf16>, vector<8x128xf32> -> vector<8x128xf32>
    %c2_16 = arith.constant 2 : index
    %c0_17 = arith.constant 0 : index
    %c0_18 = arith.constant 0 : index
    %23 = vector.load %arg3[%c2_16, %c0_17, %c0_18] : memref<3x1x128xf32, #tpu.memory_space<vmem>>, vector<1x1x128xf32>
    %24 = vector.shape_cast %23 : vector<1x1x128xf32> to vector<1x128xf32>
    %25 = vector.broadcast %24 : vector<1x128xf32> to vector<8x128xf32>
    %26 = arith.addf %22, %25 : vector<8x128xf32>
    %27 = math.tanh %26 : vector<8x128xf32>
    %c0_19 = arith.constant 0 : index
    %c0_20 = arith.constant 0 : index
    %28 = vector.load %arg4[%c0_19, %c0_20] : memref<8x128xf32, #tpu.memory_space<vmem>>, vector<8x128xf32>
    tpu.vector_store %arg4[%c0_19, %c0_20], %27 {strides = array<i32>} : memref<8x128xf32, #tpu.memory_space<vmem>>, vector<8x128xf32>,
    return
  }
  func.func @transform_0(%arg0: i32) -> (i32, i32) {
    %c0_i32 = arith.constant 0 : i32
    %c0_i32_0 = arith.constant 0 : i32
    return %arg0, %c0_i32 : i32, i32
  }
  func.func @transform_1(%arg0: i32) -> (i32, i32, i32) {
    %c0_i32 = arith.constant 0 : i32
    %c0_i32_0 = arith.constant 0 : i32
    %c0_i32_1 = arith.constant 0 : i32
    %c0_i32_2 = arith.constant 0 : i32
    return %c0_i32, %c0_i32_0, %c0_i32_1 : i32, i32, i32
  }
  func.func @transform_2(%arg0: i32) -> (i32, i32, i32) {
    %c0_i32 = arith.constant 0 : i32
    %c0_i32_0 = arith.constant 0 : i32
    %c0_i32_1 = arith.constant 0 : i32
    %c0_i32_2 = arith.constant 0 : i32
    return %c0_i32, %c0_i32_0, %c0_i32_1 : i32, i32, i32
  }
  func.func @transform_3(%arg0: i32) -> (i32, i32) {
    %c0_i32 = arith.constant 0 : i32
    %c0_i32_0 = arith.constant 0 : i32
    return %arg0, %c0_i32 : i32, i32
  }
}

</mosaic_0001>

<bundles_post_ra>
// kernel: tpu_custom_call.1
= control target key start
LH: loop header
LB: loop body
LE: loop exit
PB: predicated region body
PF: predicated region fallthrough
CT: control target
= control target key end

     0   :  { %8 = vsyncpa [#allocation3], 0  ;;  %s527_s0 = inlined_call_operand.hbm [shape: f32[8,16], index: 0, kind: input, shape index: {}]   ;;  %s528_s1 = inlined_call_operand.hbm [shape: bf16[3,128,128], index: 1, kind: input, shape index: {}]   ;;  %s529_s2 = inlined_call_operand.hbm [shape: f32[3,1,128], index: 2, kind: input, shape index: {}]   ;;  %s530_s3 = inlined_call_operand.hbm [shape: f32[8,128], index: 3, kind: output, shape index: {}]  }
   0x1   :  { %9 = vsyncpa [#allocation6], 0  ;;  %s26_s14 = sshll.u32 %s528_s1, 4  ;;  %s27_s14 = int_to_ptr.hbm [resolvable:$true] %s26_s14 }
   0x2   :  { %10 = vsyncpa [#allocation4], 0  ;;  %s487_s15 = smov [#allocation5]   ;;  %s16_s19 = sshll.u32 %s527_s0, 4  ;;  %s17_s19 = int_to_ptr.hbm [resolvable:$true] %s16_s19 }
   0x3   :  { %s28_s16 = sshll.u32 %s487_s15, 4  ;;  %s488_s20 = smov 64   ;;  %s29_s16 = int_to_ptr.vmem [resolvable:$true] %s28_s16 }
   0x4   :  { %s489_s21 = smov 4   ;;  %s490_s22 = smov [#allocation2]  }
   0x5   :  { %34 = dma.hbm_to_vmem [thread:$0]  %s27_s14, 3072, %s29_s16, [#allocation6], %s488_s20, %s488_s20, %s489_s21  }
   0x6   :  { %s18_s23 = sshll.u32 %s490_s22, 4  ;;  %s39_s26 = sshll.u32 %s529_s2, 4  ;;  %s19_s23 = int_to_ptr.vmem [resolvable:$true] %s18_s23  ;;  %s40_s26 = int_to_ptr.hbm [resolvable:$true] %s39_s26 }
   0x7   :  { %21 = dma.hbm_to_vmem [thread:$0]  %s17_s19, 128, %s19_s23, [#allocation3]  }
   0x8   :  { %s491_s1 = smov [#allocation7]   ;;  %s492_s28 = smov 16  }
   0x9   :  { %s41_s27 = sshll.u32 %s491_s1, 4  ;;  %s493_s29 = smov 1   ;;  %s42_s27 = int_to_ptr.vmem [resolvable:$true] %s41_s27 }
   0xa   :  { %47 = dma.hbm_to_vmem [thread:$0]  %s40_s26, 48, %s42_s27, [#allocation6], %s492_s28, %s492_s28, %s493_s29  }
   0xb   :  { %481 = dma.done.wait [#allocation3], 128  }
   0xc   :  { %482 = vsyncadd [#allocation3], 4294967168 }
   0xd   :  { %483 = dma.done.wait [#allocation6], 3120  }
   0xe   :  { %484 = vsyncadd [#allocation6], 4294964176  ;;  %v351_v0 = vld [vmem:[#allocation5] sm:$0xff]  ;;  %v61_v1 = vld [vmem:[#allocation2] sm:$0xff]  ;;  %vm75_vm0 = vcmask 130048   ;;  %s494_s0 = smov [#allocation8]  }
   0xf   :  { %v359_v2 = vld [vmem:[#allocation5 + $0x78] sm:$0xff]  ;;  %v62_v3 = vpack.c.bf16 %v61_v1, %v61_v1  ;;  %86 = vmatpush.bf16.msra.mxu0 %v351_v0  ;;  %v358_v4 = vld [vmem:[#allocation5 + $0x70] sm:$0xff]  ;;  %v357_v5 = vld [vmem:[#allocation5 + $0x68] sm:$0xff]  ;;  %s269_s2 = sshll.u32 %s494_s0, 4  ;;  %s271_s5 = sshll.u32 %s530_s3, 4  ;;  %s270_s2 = int_to_ptr.vmem [resolvable:$true] %s269_s2  ;;  %s272_s5 = int_to_ptr.hbm [resolvable:$true] %s271_s5 }
  0x10   :  { %164 = vmatpush.bf16.msra.mxu1 %v359_v2  ;;  %v356_v6 = vld [vmem:[#allocation5 + $0x60] sm:$0xff]  ;;  %v355_v7 = vld [vmem:[#allocation5 + $0x58] sm:$0xff]  ;;  %v354_v8 = vld [vmem:[#allocation5 + $0x50] sm:$0xff] }
  0x11   :  { %v353_v9 = vld [vmem:[#allocation5 + $0x48] sm:$0xff]  ;;  %v352_v10 = vld [vmem:[#allocation5 + $0x40] sm:$0xff]  ;;  %v367_v11 = vld [vmem:[#allocation5 + $0xb8] sm:$0xff] }
  0x12   :  { %286 = vmatmul.msk.bf16.vlgmr.msra.gmra.mxu0 %vm75_vm0, %v62_v3  ;;  %249 = vmatpush.bf16.msra.mxu2 %v367_v11  ;;  %v366_v12 = vld [vmem:[#allocation5 + $0xb0] sm:$0xff]  ;;  %v365_v13 = vld [vmem:[#allocation5 + $0xa8] sm:$0xff]  ;;  %v364_v14 = vld [vmem:[#allocation5 + $0xa0] sm:$0xff] }
  0x13   :  { %v363_v15 = vld [vmem:[#allocation5 + $0x98] sm:$0xff]  ;;  %v376_v16 = vld [vmem:[#allocation7] ss:$0 sm:$0xff]  ;;  %v362_v22 = vld [vmem:[#allocation5 + $0x90] sm:$0xff] }
  0x14   :  { %165 = vmatpush.bf16.msra.mxu1 %v358_v4  ;;  %v361_v23 = vld [vmem:[#allocation5 + $0x88] sm:$0xff]  ;;  %v360_v24 = vld [vmem:[#allocation5 + $0x80] sm:$0xff] }
  0x15   :  { %v377_v25 = vld [vmem:[#allocation7 + $0x1] ss:$0 sm:$0xff]  ;;  %v378_v31 = vld [vmem:[#allocation7 + $0x2] ss:$0 sm:$0xff] }
  0x16   :  { %250 = vmatpush.bf16.msra.mxu2 %v366_v12 }
  0x18   :  { %166 = vmatpush.bf16.msra.mxu1 %v357_v5 }
  0x1a   :  { %251 = vmatpush.bf16.msra.mxu2 %v365_v13 }
  0x1c   :  { %167 = vmatpush.bf16.msra.mxu1 %v356_v6 }
  0x1e   :  { %252 = vmatpush.bf16.msra.mxu2 %v364_v14 }
  0x20   :  { %168 = vmatpush.bf16.msra.mxu1 %v355_v7 }
  0x22   :  { %253 = vmatpush.bf16.msra.mxu2 %v363_v15 }
  0x24   :  { %169 = vmatpush.bf16.msra.mxu1 %v354_v8 }
  0x26   :  { %254 = vmatpush.bf16.msra.mxu2 %v362_v22 }
  0x28   :  { %170 = vmatpush.bf16.msra.mxu1 %v353_v9 }
  0x2a   :  { %255 = vmatpush.bf16.msra.mxu2 %v361_v23 }
  0x2c   :  { %171 = vmatpush.bf16.msra.mxu1 %v352_v10 }
  0x2e   :  { %256 = vmatpush.bf16.msra.mxu2 %v360_v24 }
  0x8f   :  { %v88_v17 = vpop.f32.mrf.mxu0 }
  0x90   :  { %v89_v18 = vadd.f32 %v376_v16, %v88_v17 }
  0x92   :  { %379 = vtanh.f32 %v89_v18 }
  0x97   :  { %v90_v19 = vpop.f32.mrf.mxu0 }
  0x98   :  { %v380_v20 = vpop.eup %379 }
  0x99   :  { %v93_v21 = vpack.c.bf16 %v380_v20, %v380_v20 }
  0x9b   :  { %172 = vmatmul.bf16.vlgmr.msra.gmra.mxu1 %v93_v21 }
 0x118   :  { %v173_v26 = vpop.f32.mrf.mxu1 }
 0x119   :  { %v174_v27 = vadd.f32 %v377_v25, %v173_v26 }
 0x11b   :  { %381 = vtanh.f32 %v174_v27 }
 0x120   :  { %v175_v28 = vpop.f32.mrf.mxu1 }
 0x121   :  { %v382_v29 = vpop.eup %381 }
 0x122   :  { %v178_v30 = vpack.c.bf16 %v382_v29, %v382_v29 }
 0x124   :  { %257 = vmatmul.bf16.vlgmr.msra.gmra.mxu2 %v178_v30 }
 0x1a7   :  { %v258_v32 = vpop.f32.mrf.mxu2 }
 0x1a8   :  { %v259_v33 = vadd.f32 %v378_v31, %v258_v32 }
 0x1aa   :  { %383 = vtanh.f32 %v259_v33 }
 0x1af   :  { %v260_v34 = vpop.f32.mrf.mxu2 }
 0x1b0   :  { %v384_v35 = vpop.eup %383 }
 0x1b1   :  { %263 = vst [vmem:[#allocation8] sm:$0xff] %v384_v35 }
 0x1b2   :  { %274 = dma.vmem_to_hbm [thread:$0]  %s270_s2, 128, %s272_s5, [#allocation4]  }
 0x1b3   :  { %485 = dma.done.wait [#allocation4], 128  }
 0x1b4   :  { %486 = vsyncadd [#allocation4], 4294967168 }
 0x1b5   :  { %279 = vsyncpa [#allocation3], 1 }
 0x1b6   :  { %280 = vsyncpa [#allocation6], 1 }
 0x1b7   :  { %281 = vsyncpa [#allocation4], 1 }

</bundles_post_ra>
